<compile_context>
chip_gen: v7x
topology: tpu7x:2x2x1
jax: 0.10.0
libtpu: 0.0.40
codegen_flags: <defaults>
</compile_context>

<pallas_src>
import functools

import jax
import jax.numpy as jnp
from jax.experimental import pallas as pl
from jax.experimental.pallas import tpu as pltpu


def _round_up(x, m):
    return ((x + m - 1) // m) * m


def _vmem_capacity_bytes():
    """Physical VMEM per TensorCore; conservative fallback if query fails."""
    try:
        cap = int(pltpu.get_tpu_info().vmem_capacity_bytes)
        if cap > 0:
            return cap
    except Exception:
        pass
    return 64 * 1024 * 1024  # v7x-sized conservative default


def _vmem_estimate(tm, H, tn, xb, wb):
    """Double-buffered tile footprint + in-kernel f32 temporaries (bytes)."""
    return int(
        2 * tm * H * xb            # x tile (double buffered)
        + 2 * H * (2 * tn) * wb    # fused gate|up weight block
        + 2 * tn * H * wb          # down-proj weight block
        + 2 * tm * H * xb          # output tile
        + tm * H * 4               # f32 accumulator scratch
        + 4 * tm * tn * 4          # f32 temporaries: gu (2x), hidden, cast slack
    )


_TM_CANDIDATES = (1024, 768, 512, 384, 256, 128, 64, 32, 16)


def _pick_tm(M, H, tn, xb, wb, budget):
    """Largest token tile whose footprint fits the VMEM budget."""
    m_ceil = _round_up(M, 16)
    for tm in _TM_CANDIDATES:
        tm_eff = _round_up(min(tm, m_ceil), 16)
        if _vmem_estimate(tm_eff, H, tn, xb, wb) <= budget:
            return tm_eff
    return 16


def _mlp_kernel(x_ref, gu_ref, dw_ref, o_ref, acc_ref, *, tn):
    # x_ref:  (tm, H)       token tile (resident across j)
    # gu_ref: (H, 2*tn)     fused [gate_block | up_block] weights (contiguous)
    # dw_ref: (tn, H)       down_proj weight block
    # o_ref:  (tm, H)       output tile (resident across j)
    # acc_ref:(tm, H) f32   VMEM accumulator
    j = pl.program_id(1)

    x = x_ref[...]
    # One fused matmul for gate and up projections of this I-chunk.
    gu = jnp.dot(x, gu_ref[...], preferred_element_type=jnp.float32)  # (tm, 2*tn)
    gate = gu[:, :tn]
    up = gu[:, tn:]
    # SiLU(gate) * up in f32 (sigmoid goes to the EUP slot).
    hidden = (gate * jax.nn.sigmoid(gate)) * up
    contrib = jnp.dot(hidden.astype(x.dtype), dw_ref[...],
                      preferred_element_type=jnp.float32)             # (tm, H)

    @pl.when(j == 0)
    def _first():
        acc_ref[...] = contrib          # no zero-init + add on the first step

    @pl.when(j > 0)
    def _accumulate():
        acc_ref[...] += contrib

    @pl.when(j == pl.num_programs(1) - 1)
    def _finalize():
        o_ref[...] = acc_ref[...].astype(o_ref.dtype)


def prepare_mlp_weights(gate_w, up_w, down_w, *, tn=None, dtype=None):
    """One-time weight preparation (call at init, NOT per forward).

    gate_w, up_w : (I, H)  torch nn.Linear layout (out_features, in_features)
    down_w       : (H, I)

    Returns (gu_blk, dw_t, tn_eff):
      gu_blk : (nj, H, 2*tn_eff)  per-j contiguous [gate | up] weight blocks
      dw_t   : (I_pad, H)         transposed down_proj weights (zero-padded)
      tn_eff : I-tile size actually used (multiple of 128)
    """
    I, H = gate_w.shape
    if dtype is not None:
        gate_w = gate_w.astype(dtype)
        up_w = up_w.astype(dtype)
        down_w = down_w.astype(dtype)

    if tn is None:
        # Smaller I-tiles on 64 MiB-VMEM parts (v7x) leave room for a bigger tm.
        tn = 256 if _vmem_capacity_bytes() <= 64 * 1024 * 1024 else 512

    tn_eff = _round_up(min(tn, _round_up(I, 128)), 128)
    i_pad = _round_up(I, tn_eff)
    nj = i_pad // tn_eff

    g_t = gate_w.T  # (H, I)
    u_t = up_w.T    # (H, I)
    d_t = down_w.T  # (I, H)
    if i_pad != I:
        pad = i_pad - I
        g_t = jnp.pad(g_t, ((0, 0), (0, pad)))
        u_t = jnp.pad(u_t, ((0, 0), (0, pad)))
        d_t = jnp.pad(d_t, ((0, pad), (0, 0)))

    g_blk = g_t.reshape(H, nj, tn_eff).transpose(1, 0, 2)   # (nj, H, tn)
    u_blk = u_t.reshape(H, nj, tn_eff).transpose(1, 0, 2)   # (nj, H, tn)
    gu_blk = jnp.concatenate([g_blk, u_blk], axis=2)         # (nj, H, 2*tn)
    return gu_blk, d_t, tn_eff


@functools.partial(jax.jit, static_argnames=("tn", "tm"))
def mlp_forward(x, gu_blk, dw_t, *, tn, tm=None):
    """x: (B, S, H).  gu_blk/dw_t: outputs of prepare_mlp_weights (same tn)."""
    B, S, H = x.shape
    i_pad, _ = dw_t.shape
    assert i_pad % tn == 0
    nj = i_pad // tn
    assert gu_blk.shape == (nj, H, 2 * tn)

    M = B * S
    xb = x.dtype.itemsize
    wb = gu_blk.dtype.itemsize

    cap = _vmem_capacity_bytes()
    budget = int(cap * 0.8)        # ~20% headroom for Mosaic internal scratch

    if tm is None:
        tm_eff = _pick_tm(M, H, tn, xb, wb, budget)
    else:
        tm_eff = _round_up(min(tm, _round_up(M, 16)), 16)

    m_pad = _round_up(M, tm_eff)
    x2d = x.reshape(M, H)
    if m_pad != M:
        x2d = jnp.pad(x2d, ((0, m_pad - M), (0, 0)))

    grid_m = m_pad // tm_eff
    grid_j = nj

    est = _vmem_estimate(tm_eff, H, tn, xb, wb)
    vmem_limit = min(cap, max(budget, int(est * 1.15)))

    flops = 6 * m_pad * H * i_pad                      # gate + up + down matmuls
    # x and out move once; weights are re-streamed once per token tile (grid_m).
    bytes_accessed = (m_pad * H * xb
                      + grid_m * (gu_blk.size + dw_t.size) * wb
                      + m_pad * H * xb)
    cost = pl.CostEstimate(flops=flops,
                           transcendentals=m_pad * i_pad,   # sigmoid
                           bytes_accessed=bytes_accessed)

    out2d = pl.pallas_call(
        functools.partial(_mlp_kernel, tn=tn),
        out_shape=jax.ShapeDtypeStruct((m_pad, H), x.dtype),
        grid_spec=pltpu.PrefetchScalarGridSpec(
            num_scalar_prefetch=0,
            grid=(grid_m, grid_j),
            in_specs=[
                pl.BlockSpec((tm_eff, H), lambda i, j: (i, 0)),           # x tile
                pl.BlockSpec((None, H, 2 * tn), lambda i, j: (j, 0, 0)),  # gate|up
                pl.BlockSpec((tn, H), lambda i, j: (j, 0)),               # down blk
            ],
            out_specs=pl.BlockSpec((tm_eff, H), lambda i, j: (i, 0)),
            scratch_shapes=[pltpu.VMEM((tm_eff, H), jnp.float32)],
        ),
        compiler_params=pltpu.CompilerParams(
            dimension_semantics=("parallel", "arbitrary"),
            vmem_limit_bytes=vmem_limit,
        ),
        cost_estimate=cost,
    )(x2d, gu_blk, dw_t)

    if m_pad != M:
        out2d = out2d[:M]
    return out2d.reshape(B, S, H)


def _reference(x, gate_w, up_w, down_w):
    g = jnp.einsum("bsh,ih->bsi", x, gate_w)
    u = jnp.einsum("bsh,ih->bsi", x, up_w)
    h = (g * jax.nn.sigmoid(g)) * u
    return jnp.einsum("bsi,hi->bsh", h, down_w)


if __name__ == "__main__":
    key = jax.random.PRNGKey(0)
    k_x, k_g, k_u, k_d = jax.random.split(key, 4)

    batch, seq, hidden, intermediate = 2, 8, 128, 256

    x = jax.random.normal(k_x, (batch, seq, hidden), dtype=jnp.float32)
    # torch nn.Linear weight layout: (out_features, in_features)
    scale_h = 1.0 / (hidden ** 0.5)
    scale_i = 1.0 / (intermediate ** 0.5)
    gate_w = jax.random.uniform(k_g, (intermediate, hidden), jnp.float32,
                                -scale_h, scale_h)
    up_w = jax.random.uniform(k_u, (intermediate, hidden), jnp.float32,
                              -scale_h, scale_h)
    down_w = jax.random.uniform(k_d, (hidden, intermediate), jnp.float32,
                                -scale_i, scale_i)

    ref = _reference(x, gate_w, up_w, down_w)

    # --- f32 path (exactness check) ---------------------------------------
    gu_w, dw_t, tn = prepare_mlp_weights(gate_w, up_w, down_w)
    out = mlp_forward(x, gu_w, dw_t, tn=tn)
    out = jax.block_until_ready(out)
    assert out.shape == (batch, seq, hidden)
    assert jnp.allclose(out, ref, atol=1e-4, rtol=1e-4)

    # --- bf16 path (recommended production dtype; f32 accumulation) -------
    gu_bf, dw_bf, tn_bf = prepare_mlp_weights(gate_w, up_w, down_w,
                                              dtype=jnp.bfloat16)
    out_bf = mlp_forward(x.astype(jnp.bfloat16), gu_bf, dw_bf, tn=tn_bf)
    out_bf = jax.block_until_ready(out_bf)
    assert out_bf.shape == (batch, seq, hidden)
    assert jnp.allclose(out_bf.astype(jnp.float32), ref, atol=5e-2, rtol=5e-2)

    print("KERNEL_OK")
</pallas_src>

<mosaic_0001>
module attributes {stable_mosaic.version = 11 : i64} {
  func.func @_mlp_kernel(%arg0: i32, %arg1: i32, %arg2: memref<16x128xf32, #tpu.memory_space<vmem>>, %arg3: memref<1x128x512xf32, #tpu.memory_space<vmem>>, %arg4: memref<256x128xf32, #tpu.memory_space<vmem>>, %arg5: memref<16x128xf32, #tpu.memory_space<vmem>>, %arg6: memref<16x128xf32, #tpu.memory_space<vmem>>) attributes {dimension_semantics = [#tpu.dimension_semantics<parallel>, #tpu.dimension_semantics<arbitrary>], iteration_bounds = array<i64: 1, 1>, scalar_prefetch = 0 : i64, scratch_operands = 1 : i64, tpu.core_type = #tpu.core_type<tc>, window_params = [{transform_indices = @transform_0, window_bounds = array<i64: 16, 128>}, {transform_indices = @transform_1, window_bounds = array<i64: 1, 128, 512>}, {transform_indices = @transform_2, window_bounds = array<i64: 256, 128>}, {transform_indices = @transform_3, window_bounds = array<i64: 16, 128>}]} {
    %c0 = arith.constant 0 : index
    %c0_0 = arith.constant 0 : index
    %0 = vector.load %arg2[%c0, %c0_0] : memref<16x128xf32, #tpu.memory_space<vmem>>, vector<16x128xf32>
    %c0_1 = arith.constant 0 : index
    %c0_2 = arith.constant 0 : index
    %c0_3 = arith.constant 0 : index
    %1 = vector.load %arg3[%c0_1, %c0_2, %c0_3] : memref<1x128x512xf32, #tpu.memory_space<vmem>>, vector<1x128x512xf32>
    %2 = vector.shape_cast %1 : vector<1x128x512xf32> to vector<128x512xf32>
    %cst = arith.constant dense<0.000000e+00> : vector<16x512xf32>
    %3 = tpu.matmul %0, %2, %cst {dimension_numbers = #tpu.dot_dimension_numbers<[1], [0], [0], [1], [0, 0, 1, 1], [], []>} : vector<16x128xf32>, vector<128x512xf32>, vector<16x512xf32> -> vector<16x512xf32>
    %4 = vector.extract_strided_slice %3 {offsets = [0, 0], sizes = [16, 256], strides = [1, 1]} : vector<16x512xf32> to vector<16x256xf32>
    %5 = vector.extract_strided_slice %3 {offsets = [0, 256], sizes = [16, 256], strides = [1, 1]} : vector<16x512xf32> to vector<16x256xf32>
    %6 = arith.negf %4 : vector<16x256xf32>
    %7 = math.exp %6 : vector<16x256xf32>
    %cst_4 = arith.constant 1.000000e+00 : f32
    %8 = vector.broadcast %cst_4 : f32 to vector<16x256xf32>
    %9 = arith.addf %8, %7 : vector<16x256xf32>
    %10 = arith.divf %8, %9 : vector<16x256xf32>
    %11 = arith.mulf %4, %10 : vector<16x256xf32>
    %12 = arith.mulf %11, %5 : vector<16x256xf32>
    %c0_5 = arith.constant 0 : index
    %c0_6 = arith.constant 0 : index
    %13 = vector.load %arg4[%c0_5, %c0_6] : memref<256x128xf32, #tpu.memory_space<vmem>>, vector<256x128xf32>
    %cst_7 = arith.constant dense<0.000000e+00> : vector<16x128xf32>
    %14 = tpu.matmul %12, %13, %cst_7 {dimension_numbers = #tpu.dot_dimension_numbers<[1], [0], [0], [1], [0, 0, 1, 1], [], []>} : vector<16x256xf32>, vector<256x128xf32>, vector<16x128xf32> -> vector<16x128xf32>
    %c0_i32 = arith.constant 0 : i32
    %15 = arith.cmpi eq, %arg1, %c0_i32 : i32
    %16 = arith.extui %15 : i1 to i32
    %c0_i32_8 = arith.constant 0 : i32
    %17 = arith.cmpi ne, %16, %c0_i32_8 : i32
    scf.if %17 {
      %c0_13 = arith.constant 0 : index
      %c0_14 = arith.constant 0 : index
      %24 = vector.load %arg6[%c0_13, %c0_14] : memref<16x128xf32, #tpu.memory_space<vmem>>, vector<16x128xf32>
      tpu.vector_store %arg6[%c0_13, %c0_14], %14 {strides = array<i32>} : memref<16x128xf32, #tpu.memory_space<vmem>>, vector<16x128xf32>,
    } else {
    }
    %c0_i32_9 = arith.constant 0 : i32
    %18 = arith.cmpi sgt, %arg1, %c0_i32_9 : i32
    %19 = arith.extui %18 : i1 to i32
    %c0_i32_10 = arith.constant 0 : i32
    %20 = arith.cmpi ne, %19, %c0_i32_10 : i32
    scf.if %20 {
      %c0_13 = arith.constant 0 : index
      %c0_14 = arith.constant 0 : index
      %24 = vector.load %arg6[%c0_13, %c0_14] : memref<16x128xf32, #tpu.memory_space<vmem>>, vector<16x128xf32>
      %25 = arith.addf %24, %14 : vector<16x128xf32>
      %c0_15 = arith.constant 0 : index
      %c0_16 = arith.constant 0 : index
      %26 = vector.load %arg6[%c0_15, %c0_16] : memref<16x128xf32, #tpu.memory_space<vmem>>, vector<16x128xf32>
      tpu.vector_store %arg6[%c0_15, %c0_16], %25 {strides = array<i32>} : memref<16x128xf32, #tpu.memory_space<vmem>>, vector<16x128xf32>,
    } else {
    }
    %c0_i32_11 = arith.constant 0 : i32
    %21 = arith.cmpi eq, %arg1, %c0_i32_11 : i32
    %22 = arith.extui %21 : i1 to i32
    %c0_i32_12 = arith.constant 0 : i32
    %23 = arith.cmpi ne, %22, %c0_i32_12 : i32
    scf.if %23 {
      %c0_13 = arith.constant 0 : index
      %c0_14 = arith.constant 0 : index
      %24 = vector.load %arg6[%c0_13, %c0_14] : memref<16x128xf32, #tpu.memory_space<vmem>>, vector<16x128xf32>
      %c0_15 = arith.constant 0 : index
      %c0_16 = arith.constant 0 : index
      %25 = vector.load %arg5[%c0_15, %c0_16] : memref<16x128xf32, #tpu.memory_space<vmem>>, vector<16x128xf32>
      tpu.vector_store %arg5[%c0_15, %c0_16], %24 {strides = array<i32>} : memref<16x128xf32, #tpu.memory_space<vmem>>, vector<16x128xf32>,
    } else {
    }
    return
  }
  func.func @transform_0(%arg0: i32, %arg1: i32) -> (i32, i32) {
    %c0_i32 = arith.constant 0 : i32
    %c0_i32_0 = arith.constant 0 : i32
    return %arg0, %c0_i32 : i32, i32
  }
  func.func @transform_1(%arg0: i32, %arg1: i32) -> (i32, i32, i32) {
    %c0_i32 = arith.constant 0 : i32
    %c0_i32_0 = arith.constant 0 : i32
    %c0_i32_1 = arith.constant 0 : i32
    return %arg1, %c0_i32, %c0_i32_0 : i32, i32, i32
  }
  func.func @transform_2(%arg0: i32, %arg1: i32) -> (i32, i32) {
    %c0_i32 = arith.constant 0 : i32
    %c0_i32_0 = arith.constant 0 : i32
    return %arg1, %c0_i32 : i32, i32
  }
  func.func @transform_3(%arg0: i32, %arg1: i32) -> (i32, i32) {
    %c0_i32 = arith.constant 0 : i32
    %c0_i32_0 = arith.constant 0 : i32
    return %arg0, %c0_i32 : i32, i32
  }
}

</mosaic_0001>

<bundles_post_ra>
// kernel: mlp_forward.1
= control target key start
LH: loop header
LB: loop body
LE: loop exit
PB: predicated region body
PF: predicated region fallthrough
CT: control target
= control target key end

     0   :  { %8 = vsyncpa [#allocation4], 0  ;;  %s819_s0 = inlined_call_operand.hbm [shape: f32[16,128], index: 0, kind: input, shape index: {}]   ;;  %s820_s1 = inlined_call_operand.hbm [shape: f32[1,128,512], index: 1, kind: input, shape index: {}]   ;;  %s821_s2 = inlined_call_operand.hbm [shape: f32[256,128], index: 2, kind: input, shape index: {}]   ;;  %s822_s3 = inlined_call_operand.hbm [shape: f32[16,128], index: 3, kind: output, shape index: {}]  }
   0x1   :  { %9 = vsyncpa [#allocation7], 0 }
   0x2   :  { %10 = vsyncpa [#allocation5], 0  ;;  %s729_s12 = smov [#allocation6]   ;;  %s635_s16 = scalar_lea.hbm %s820_s1, 8192 }
   0x3   :  { %s28_s13 = sshll.u32 %s729_s12, 4  ;;  %p636_p0 = scmp.ne.s32.totalorder %s820_s1, %s635_s16  ;;  %s29_s13 = int_to_ptr.vmem [resolvable:$true] %s28_s13 }
   0x4   :  { %p639_p1 = scmp.lt.u32.totalorder %s635_s16, %s820_s1 }
   0x6   :  { %p641_p2 = pnand %p639_p1, %p636_p0 }
   0x8   :  { %644 = shalt.err (!%p641_p2)
}
   0x9   :  { %s645_s21 = scalar_lea.vmem %s29_s13, 8192  ;;  %p650_p4 = scmp.lt.s32.totalorder %s29_s13, %s29_s13 }
   0xa   :  { %p646_p3 = scmp.ne.s32.totalorder %s29_s13, %s645_s21  ;;  %p651_p5 = scmp.lt.s32.totalorder %s645_s21, %s645_s21 }
   0xc   :  { %p652_p6 = por %p651_p5, %p650_p4 }
   0xe   :  { %p653_p7 = pnand %p652_p6, %p646_p3 }
  0x10   :  { %656 = shalt.err (!%p653_p7)
}
  0x11   :  { %s730_s22 = smov 512   ;;  %s731_s23 = smov 32  }
  0x12   :  { %34 = dma.hbm_to_vmem [thread:$0]  %s820_s1, 8192, %s29_s13, [#allocation7], %s730_s22, %s730_s22, %s731_s23  }
  0x13   :  { %s732_s26 = smov [#allocation3]   ;;  %s657_s30 = scalar_lea.hbm %s819_s0, 256 }
  0x14   :  { %s16_s27 = sshll.u32 %s732_s26, 4  ;;  %p658_p8 = scmp.ne.s32.totalorder %s819_s0, %s657_s30  ;;  %s17_s27 = int_to_ptr.vmem [resolvable:$true] %s16_s27 }
  0x15   :  { %p661_p9 = scmp.lt.u32.totalorder %s657_s30, %s819_s0 }
  0x17   :  { %p663_p10 = pnand %p661_p9, %p658_p8 }
  0x19   :  { %666 = shalt.err (!%p663_p10)
}
  0x1a   :  { %s667_s8 = scalar_lea.vmem %s17_s27, 256  ;;  %p672_p12 = scmp.lt.s32.totalorder %s17_s27, %s17_s27 }
  0x1b   :  { %p668_p11 = scmp.ne.s32.totalorder %s17_s27, %s667_s8  ;;  %p673_p13 = scmp.lt.s32.totalorder %s667_s8, %s667_s8 }
  0x1d   :  { %p674_p0 = por %p673_p13, %p672_p12 }
  0x1f   :  { %p675_p1 = pnand %p674_p0, %p668_p11 }
  0x21   :  { %678 = shalt.err (!%p675_p1)
}
  0x22   :  { %s733_s1 = smov 128   ;;  %s734_s9 = smov 8  }
  0x23   :  { %22 = dma.hbm_to_vmem [thread:$0]  %s819_s0, 256, %s17_s27, [#allocation4], %s733_s1, %s733_s1, %s734_s9  }
  0x24   :  { %s735_s12 = smov [#allocation8]   ;;  %s679_s16 = scalar_lea.hbm %s821_s2, 4096 }
  0x25   :  { %s40_s13 = sshll.u32 %s735_s12, 4  ;;  %p680_p2 = scmp.ne.s32.totalorder %s821_s2, %s679_s16  ;;  %s41_s13 = int_to_ptr.vmem [resolvable:$true] %s40_s13 }
  0x26   :  { %p683_p3 = scmp.lt.u32.totalorder %s679_s16, %s821_s2 }
  0x28   :  { %p685_p4 = pnand %p683_p3, %p680_p2 }
  0x2a   :  { %688 = shalt.err (!%p685_p4)
}
  0x2b   :  { %s689_s21 = scalar_lea.vmem %s41_s13, 4096  ;;  %p694_p6 = scmp.lt.s32.totalorder %s41_s13, %s41_s13 }
  0x2c   :  { %p690_p5 = scmp.ne.s32.totalorder %s41_s13, %s689_s21  ;;  %p695_p7 = scmp.lt.s32.totalorder %s689_s21, %s689_s21 }
  0x2e   :  { %p696_p8 = por %p695_p7, %p694_p6 }
  0x30   :  { %p697_p9 = pnand %p696_p8, %p690_p5 }
  0x32   :  { %700 = shalt.err (!%p697_p9)
}
  0x33   :  { %46 = dma.hbm_to_vmem [thread:$0]  %s821_s2, 4096, %s41_s13, [#allocation7], %s733_s1, %s733_s1, %s734_s9  }
  0x34   :  { %723 = dma.done.wait [#allocation4], 256  }
  0x35   :  { %724 = vsyncadd [#allocation4], 4294967040 }
  0x36   :  { %725 = dma.done.wait [#allocation7], 12288  }
  0x37   :  { %726 = vsyncadd [#allocation7], 4294955008  ;;  %v736_v0 = vmov 0.0   ;;  %v59_v1 = vld [vmem:[#allocation6 + $0x8] sm:$0xff]  ;;  %v58_v3 = vld [vmem:[#allocation6] sm:$0xff]  ;;  %s737_s2 = smov [#allocation9]  }
  0x38   :  { %186 = vmatprep.mubr.f32.mxu0 %v736_v0  ;;  %263 = vmatprep.mubr.f32.mxu1 %v736_v0  ;;  %v63_v2 = vld [vmem:[#allocation6 + $0x28] sm:$0xff]  ;;  %v62_v5 = vld [vmem:[#allocation6 + $0x20] sm:$0xff]  ;;  %v61_v24 = vld [vmem:[#allocation6 + $0x18] sm:$0xff]  ;;  %s443_s23 = sshll.u32 %s737_s2, 4  ;;  %s444_s23 = int_to_ptr.vmem [resolvable:$true] %s443_s23 }
  0x39   :  { %v498_v4 = vpack.c.bf16 %v63_v2, %v59_v1  ;;  %v67_v6 = vld [vmem:[#allocation6 + $0x48] sm:$0xff]  ;;  %v500_v8 = vpack.c.bf16 %v62_v5, %v58_v3  ;;  %v66_v10 = vld [vmem:[#allocation6 + $0x40] sm:$0xff]  ;;  %v65_v25 = vld [vmem:[#allocation6 + $0x38] sm:$0xff]  ;;  %s701_s24 = scalar_lea.vmem %s444_s23, 256  ;;  %p706_p11 = scmp.lt.s32.totalorder %s444_s23, %s444_s23 }
  0x3a   :  { %v71_v7 = vld [vmem:[#allocation6 + $0x68] sm:$0xff]  ;;  %v70_v11 = vld [vmem:[#allocation6 + $0x60] sm:$0xff]  ;;  %v530_v28 = vpack.c.bf16 %v65_v25, %v61_v24  ;;  %v60_v29 = vld [vmem:[#allocation6 + $0x10] sm:$0xff]  ;;  %p702_p10 = scmp.ne.s32.totalorder %s444_s23, %s701_s24  ;;  %p707_p12 = scmp.lt.s32.totalorder %s701_s24, %s701_s24 }
  0x3b   :  { %v502_v9 = vpack.c.bf16 %v71_v7, %v67_v6  ;;  %v75_v12 = vld [vmem:[#allocation6 + $0x88] sm:$0xff]  ;;  %499 = vmatprep.subr.bf16.mxu0 %v498_v4  ;;  %v504_v14 = vpack.c.bf16 %v70_v11, %v66_v10  ;;  %v74_v16 = vld [vmem:[#allocation6 + $0x80] sm:$0xff]  ;;  %v64_v31 = vld [vmem:[#allocation6 + $0x30] sm:$0xff] }
  0x3c   :  { %v79_v13 = vld [vmem:[#allocation6 + $0xa8] sm:$0xff]  ;;  %501 = vmatpush1.bf16.msra.mxu0 %v500_v8  ;;  %v78_v17 = vld [vmem:[#allocation6 + $0xa0] sm:$0xff]  ;;  %531 = vmatprep.subr.bf16.mxu1 %v530_v28  ;;  %v532_v34 = vpack.c.bf16 %v64_v31, %v60_v29  ;;  %v69_v35 = vld [vmem:[#allocation6 + $0x58] sm:$0xff]  ;;  %p708_p13 = por %p707_p12, %p706_p11 }
  0x3d   :  { %503 = vmatprep.subr.bf16.mxu0 %v502_v9  ;;  %v506_v15 = vpack.c.bf16 %v79_v13, %v75_v12  ;;  %v83_v18 = vld [vmem:[#allocation6 + $0xc8] sm:$0xff]  ;;  %v508_v20 = vpack.c.bf16 %v78_v17, %v74_v16  ;;  %v82_v21 = vld [vmem:[#allocation6 + $0xc0] sm:$0xff]  ;;  %v73_v36 = vld [vmem:[#allocation6 + $0x78] sm:$0xff] }
  0x3e   :  { %v87_v19 = vld [vmem:[#allocation6 + $0xe8] sm:$0xff]  ;;  %v86_v23 = vld [vmem:[#allocation6 + $0xe0] sm:$0xff]  ;;  %v534_v38 = vpack.c.bf16 %v73_v36, %v69_v35  ;;  %v68_v39 = vld [vmem:[#allocation6 + $0x50] sm:$0xff]  ;;  %533 = vmatpush1.bf16.msra.mxu1 %v532_v34  ;;  %p709_p0 = pnand %p708_p13, %p702_p10 }
  0x3f   :  { %v510_v22 = vpack.c.bf16 %v87_v19, %v83_v18  ;;  %v91_v26 = vld [vmem:[#allocation6 + $0x108] sm:$0xff]  ;;  %v90_v30 = vld [vmem:[#allocation6 + $0x100] sm:$0xff]  ;;  %v512_v32 = vpack.c.bf16 %v86_v23, %v82_v21  ;;  %v72_v40 = vld [vmem:[#allocation6 + $0x70] sm:$0xff] }
  0x40   :  { %505 = vmatpush1.bf16.msra.mxu0 %v504_v14  ;;  %v95_v27 = vld [vmem:[#allocation6 + $0x128] sm:$0xff]  ;;  %v94_v33 = vld [vmem:[#allocation6 + $0x120] sm:$0xff]  ;;  %v77_v41 = vld [vmem:[#allocation6 + $0x98] sm:$0xff]  ;;  %v536_v44 = vpack.c.bf16 %v72_v40, %v68_v39  ;;  %535 = vmatprep.subr.bf16.mxu1 %v534_v38 }
  0x41   :  { %507 = vmatprep.subr.bf16.mxu0 %v506_v15  ;;  %v514_v37 = vpack.c.bf16 %v95_v27, %v91_v26  ;;  %v99_v42 = vld [vmem:[#allocation6 + $0x148] sm:$0xff]  ;;  %v81_v45 = vld [vmem:[#allocation6 + $0xb8] sm:$0xff]  ;;  %v76_v47 = vld [vmem:[#allocation6 + $0x90] sm:$0xff]  ;;  %v516_v49 = vpack.c.bf16 %v94_v33, %v90_v30 }
  0x42   :  { %v103_v43 = vld [vmem:[#allocation6 + $0x168] sm:$0xff]  ;;  %v538_v46 = vpack.c.bf16 %v81_v45, %v77_v41  ;;  %v80_v48 = vld [vmem:[#allocation6 + $0xb0] sm:$0xff]  ;;  %v85_v50 = vld [vmem:[#allocation6 + $0xd8] sm:$0xff]  ;;  %537 = vmatpush1.bf16.msra.mxu1 %v536_v44 }
  0x43   :  { %v89_v51 = vld [vmem:[#allocation6 + $0xf8] sm:$0xff]  ;;  %v518_v52 = vpack.c.bf16 %v103_v43, %v99_v42  ;;  %v98_v53 = vld [vmem:[#allocation6 + $0x140] sm:$0xff]  ;;  %v107_v55 = vld [vmem:[#allocation6 + $0x188] sm:$0xff]  ;;  %v540_v57 = vpack.c.bf16 %v80_v48, %v76_v47 }
  0x44   :  { %509 = vmatpush1.bf16.msra.mxu0 %v508_v20  ;;  %v102_v54 = vld [vmem:[#allocation6 + $0x160] sm:$0xff]  ;;  %v111_v56 = vld [vmem:[#allocation6 + $0x1a8] sm:$0xff]  ;;  %539 = vmatprep.subr.bf16.mxu1 %v538_v46  ;;  %v542_v58 = vpack.c.bf16 %v89_v51, %v85_v50  ;;  %v84_v59 = vld [vmem:[#allocation6 + $0xd0] sm:$0xff] }
  0x45   :  { %511 = vmatprep.subr.bf16.mxu0 %v510_v22  ;;  %v88_v60 = vld [vmem:[#allocation6 + $0xf0] sm:$0xff]  ;;  %v520_v61 = vpack.c.bf16 %v102_v54, %v98_v53  ;;  %v93_v62 = vld [vmem:[#allocation6 + $0x118] sm:$0xff]  ;;  %v522_v1 = vpack.c.bf16 %v111_v56, %v107_v55  ;;  %v106_v2 = vld [vmem:[#allocation6 + $0x180] sm:$0xff] }
  0x46   :  { %v97_v63 = vld [vmem:[#allocation6 + $0x138] sm:$0xff]  ;;  %v110_v3 = vld [vmem:[#allocation6 + $0x1a0] sm:$0xff]  ;;  %v115_v4 = vld [vmem:[#allocation6 + $0x1c8] sm:$0xff]  ;;  %541 = vmatpush1.bf16.msra.mxu1 %v540_v57  ;;  %v544_v6 = vpack.c.bf16 %v88_v60, %v84_v59 }
  0x47   :  { %v119_v5 = vld [vmem:[#allocation6 + $0x1e8] sm:$0xff]  ;;  %543 = vmatprep.subr.bf16.mxu1 %v542_v58  ;;  %v546_v7 = vpack.c.bf16 %v97_v63, %v93_v62  ;;  %v92_v8 = vld [vmem:[#allocation6 + $0x110] sm:$0xff]  ;;  %v524_v10 = vpack.c.bf16 %v110_v3, %v106_v2  ;;  %v101_v11 = vld [vmem:[#allocation6 + $0x158] sm:$0xff] }
  0x48   :  { %513 = vmatpush1.bf16.msra.mxu0 %v512_v32  ;;  %v96_v9 = vld [vmem:[#allocation6 + $0x130] sm:$0xff]  ;;  %v105_v12 = vld [vmem:[#allocation6 + $0x178] sm:$0xff]  ;;  %v526_v13 = vpack.c.bf16 %v119_v5, %v115_v4  ;;  %v114_v14 = vld [vmem:[#allocation6 + $0x1c0] sm:$0xff] }
  0x49   :  { %515 = vmatprep.subr.bf16.mxu0 %v514_v37  ;;  %v118_v15 = vld [vmem:[#allocation6 + $0x1e0] sm:$0xff]  ;;  %v548_v16 = vpack.c.bf16 %v96_v9, %v92_v8  ;;  %v550_v17 = vpack.c.bf16 %v105_v12, %v101_v11  ;;  %v100_v18 = vld [vmem:[#allocation6 + $0x150] sm:$0xff]  ;;  %v109_v21 = vld [vmem:[#allocation6 + $0x198] sm:$0xff] }
  0x4a   :  { %545 = vmatpush1.bf16.msra.mxu1 %v544_v6  ;;  %v104_v19 = vld [vmem:[#allocation6 + $0x170] sm:$0xff]  ;;  %v528_v20 = vpack.c.bf16 %v118_v15, %v114_v14  ;;  %v113_v22 = vld [vmem:[#allocation6 + $0x1b8] sm:$0xff]  ;;  %v324_v36 = vld [vmem:[#allocation8 + $0x80] sm:$0xff] }
  0x4b   :  { %547 = vmatprep.subr.bf16.mxu1 %v546_v7  ;;  %v552_v23 = vpack.c.bf16 %v104_v19, %v100_v18  ;;  %v554_v24 = vpack.c.bf16 %v113_v22, %v109_v21  ;;  %v108_v25 = vld [vmem:[#allocation6 + $0x190] sm:$0xff]  ;;  %v117_v28 = vld [vmem:[#allocation6 + $0x1d8] sm:$0xff]  ;;  %v325_v37 = vld [vmem:[#allocation8 + $0x88] sm:$0xff] }
  0x4c   :  { %517 = vmatpush1.bf16.msra.mxu0 %v516_v49  ;;  %v112_v26 = vld [vmem:[#allocation6 + $0x1b0] sm:$0xff]  ;;  %v121_v29 = vld [vmem:[#allocation6 + $0x1f8] sm:$0xff]  ;;  %v562_v38 = vpack.c.bf16 %v325_v37, %v324_v36  ;;  %v308_v39 = vld [vmem:[#allocation8] sm:$0xff] }
  0x4d   :  { %519 = vmatprep.subr.bf16.mxu0 %v518_v52  ;;  %v56_v27 = vld [vmem:[#allocation3] sm:$0xff]  ;;  %v556_v30 = vpack.c.bf16 %v112_v26, %v108_v25  ;;  %v558_v31 = vpack.c.bf16 %v121_v29, %v117_v28  ;;  %v57_v34 = vld [vmem:[#allocation3 + $0x8] sm:$0xff]  ;;  %v309_v40 = vld [vmem:[#allocation8 + $0x8] sm:$0xff] }
  0x4e   :  { %549 = vmatpush1.bf16.msra.mxu1 %v548_v16  ;;  %v116_v32 = vld [vmem:[#allocation6 + $0x1d0] sm:$0xff]  ;;  %v564_v41 = vpack.c.bf16 %v309_v40, %v308_v39  ;;  %v327_v43 = vld [vmem:[#allocation8 + $0x98] sm:$0xff]  ;;  %v329_v48 = vld [vmem:[#allocation8 + $0xa8] sm:$0xff] }
  0x4f   :  { %551 = vmatprep.subr.bf16.mxu1 %v550_v17  ;;  %v120_v33 = vld [vmem:[#allocation6 + $0x1f0] sm:$0xff]  ;;  %v311_v46 = vld [vmem:[#allocation8 + $0x18] sm:$0xff]  ;;  %v312_v50 = vld [vmem:[#allocation8 + $0x20] sm:$0xff] }
  0x50   :  { %521 = vmatpush1.bf16.msra.mxu0 %v520_v61  ;;  %v560_v35 = vpack.c.bf16 %v120_v33, %v116_v32  ;;  %v326_v42 = vld [vmem:[#allocation8 + $0x90] sm:$0xff]  ;;  %v313_v51 = vld [vmem:[#allocation8 + $0x28] sm:$0xff]  ;;  %v331_v54 = vld [vmem:[#allocation8 + $0xb8] sm:$0xff] }
  0x51   :  { %523 = vmatprep.subr.bf16.mxu0 %v522_v1  ;;  %v566_v44 = vpack.c.bf16 %v327_v43, %v326_v42  ;;  %v310_v45 = vld [vmem:[#allocation8 + $0x10] sm:$0xff]  ;;  %v572_v52 = vpack.c.bf16 %v313_v51, %v312_v50  ;;  %v315_v57 = vld [vmem:[#allocation8 + $0x38] sm:$0xff]  ;;  %v332_v59 = vld [vmem:[#allocation8 + $0xc0] sm:$0xff] }
  0x52   :  { %553 = vmatpush1.bf16.msra.mxu1 %v552_v23  ;;  %v568_v47 = vpack.c.bf16 %v311_v46, %v310_v45  ;;  %v330_v53 = vld [vmem:[#allocation8 + $0xb0] sm:$0xff]  ;;  %v333_v60 = vld [vmem:[#allocation8 + $0xc8] sm:$0xff]  ;;  %v316_v62 = vld [vmem:[#allocation8 + $0x40] sm:$0xff] }
  0x53   :  { %555 = vmatprep.subr.bf16.mxu1 %v554_v24  ;;  %v574_v55 = vpack.c.bf16 %v331_v54, %v330_v53  ;;  %v314_v56 = vld [vmem:[#allocation8 + $0x30] sm:$0xff]  ;;  %v578_v61 = vpack.c.bf16 %v333_v60, %v332_v59  ;;  %v317_v63 = vld [vmem:[#allocation8 + $0x48] sm:$0xff]  ;;  %v335_v3 = vld [vmem:[#allocation8 + $0xd8] sm:$0xff] }
  0x54   :  { %525 = vmatpush1.bf16.msra.mxu0 %v524_v10  ;;  %v576_v58 = vpack.c.bf16 %v315_v57, %v314_v56  ;;  %v580_v1 = vpack.c.bf16 %v317_v63, %v316_v62  ;;  %v334_v2 = vld [vmem:[#allocation8 + $0xd0] sm:$0xff]  ;;  %v319_v6 = vld [vmem:[#allocation8 + $0x58] sm:$0xff]  ;;  %v336_v8 = vld [vmem:[#allocation8 + $0xe0] sm:$0xff] }
  0x55   :  { %527 = vmatprep.subr.bf16.mxu0 %v526_v13  ;;  %v582_v4 = vpack.c.bf16 %v335_v3, %v334_v2  ;;  %v318_v5 = vld [vmem:[#allocation8 + $0x50] sm:$0xff]  ;;  %v337_v9 = vld [vmem:[#allocation8 + $0xe8] sm:$0xff]  ;;  %v320_v11 = vld [vmem:[#allocation8 + $0x60] sm:$0xff] }
  0x56   :  { %557 = vmatpush1.bf16.msra.mxu1 %v556_v30  ;;  %v584_v7 = vpack.c.bf16 %v319_v6, %v318_v5  ;;  %v586_v10 = vpack.c.bf16 %v337_v9, %v336_v8  ;;  %v321_v12 = vld [vmem:[#allocation8 + $0x68] sm:$0xff]  ;;  %v338_v14 = vld [vmem:[#allocation8 + $0xf0] sm:$0xff]  ;;  %v339_v15 = vld [vmem:[#allocation8 + $0xf8] sm:$0xff] }
  0x57   :  { %559 = vmatprep.subr.bf16.mxu1 %v558_v31  ;;  %v588_v13 = vpack.c.bf16 %v321_v12, %v320_v11  ;;  %v590_v16 = vpack.c.bf16 %v339_v15, %v338_v14  ;;  %v322_v17 = vld [vmem:[#allocation8 + $0x70] sm:$0xff]  ;;  %v323_v18 = vld [vmem:[#allocation8 + $0x78] sm:$0xff] }
  0x58   :  { %529 = vmatpush1.bf16.msra.mxu0 %v528_v20  ;;  %v592_v19 = vpack.c.bf16 %v323_v18, %v322_v17 }
  0x59   :  { %563 = vmatprep.subr.bf16.mxu0 %v562_v38 }
  0x5a   :  { %561 = vmatpush1.bf16.msra.mxu1 %v560_v35 }
  0x5b   :  { %187 = vmatmul.mubr.f32.vlgmr.msra.gmra.mrb[0].mxu0 %v56_v27  ;;  %594 = vmatprep.subr.bf16.mxu1 %v562_v38 }
  0x5c   :  { %192 = vmatprep.mubr.f32.mxu0 %v736_v0  ;;  %565 = vmatpush3.bf16.msra.mxu0 %v564_v41 }
  0x5d   :  { %264 = vmatmul.mubr.f32.vlgmr.msra.gmra.mrb[0].mxu1 %v56_v27  ;;  %567 = vmatprep.subr.bf16.mxu0 %v566_v44 }
  0x5e   :  { %269 = vmatprep.mubr.f32.mxu1 %v736_v0  ;;  %602 = vmatpush3.bf16.msra.mxu1 %v564_v41  ;;  %v328_v0 = vld [vmem:[#allocation8 + $0xa0] sm:$0xff] }
  0x5f   :  { %193 = vmatmul.mubr.f32.gmra.mrb[2].mxu0 %v57_v34  ;;  %595 = vmatprep.subr.bf16.mxu1 %v566_v44  ;;  %v570_v49 = vpack.c.bf16 %v329_v48, %v328_v0 }
  0x60   :  { %569 = vmatpush3.bf16.msra.mxu0 %v568_v47 }
  0x61   :  { %270 = vmatmul.mubr.f32.gmra.mrb[2].mxu1 %v57_v34  ;;  %571 = vmatprep.subr.bf16.mxu0 %v570_v49 }
  0x62   :  { %603 = vmatpush3.bf16.msra.mxu1 %v568_v47 }
  0x63   :  { %596 = vmatprep.subr.bf16.mxu1 %v570_v49 }
  0x64   :  { %573 = vmatpush3.bf16.msra.mxu0 %v572_v52 }
  0x65   :  { %575 = vmatprep.subr.bf16.mxu0 %v574_v55 }
  0x66   :  { %604 = vmatpush3.bf16.msra.mxu1 %v572_v52 }
  0x67   :  { %597 = vmatprep.subr.bf16.mxu1 %v574_v55 }
  0x68   :  { %577 = vmatpush3.bf16.msra.mxu0 %v576_v58 }
  0x69   :  { %579 = vmatprep.subr.bf16.mxu0 %v578_v61 }
  0x6a   :  { %605 = vmatpush3.bf16.msra.mxu1 %v576_v58 }
  0x6b   :  { %598 = vmatprep.subr.bf16.mxu1 %v578_v61 }
  0x6c   :  { %581 = vmatpush3.bf16.msra.mxu0 %v580_v1 }
  0x6d   :  { %583 = vmatprep.subr.bf16.mxu0 %v582_v4 }
  0x6e   :  { %606 = vmatpush3.bf16.msra.mxu1 %v580_v1 }
  0x6f   :  { %599 = vmatprep.subr.bf16.mxu1 %v582_v4 }
  0x70   :  { %585 = vmatpush3.bf16.msra.mxu0 %v584_v7 }
  0x71   :  { %587 = vmatprep.subr.bf16.mxu0 %v586_v10 }
  0x72   :  { %607 = vmatpush3.bf16.msra.mxu1 %v584_v7 }
  0x73   :  { %600 = vmatprep.subr.bf16.mxu1 %v586_v10 }
  0x74   :  { %589 = vmatpush3.bf16.msra.mxu0 %v588_v13 }
  0x75   :  { %591 = vmatprep.subr.bf16.mxu0 %v590_v16 }
  0x76   :  { %608 = vmatpush3.bf16.msra.mxu1 %v588_v13 }
  0x77   :  { %601 = vmatprep.subr.bf16.mxu1 %v590_v16 }
  0x78   :  { %593 = vmatpush3.bf16.msra.mxu0 %v592_v19 }
  0x7a   :  { %609 = vmatpush3.bf16.msra.mxu1 %v592_v19 }
 0x12e   :  { %v188_v20 = vpop.f32.mrb[0].mxu0 }
 0x12f   :  { %v456_v21 = vmul.f32 -1.442695, %v188_v20  ;;  %v190_v22 = vpop.f32.mrb[1].mxu0 }
 0x130   :  { %v457_v23 = vmul.f32 -1.442695, %v190_v22  ;;  %v265_v28 = vpop.f32.mrb[0].mxu1 }
 0x131   :  { %619 = vpow2.f32 %v456_v21  ;;  %v267_v29 = vpop.f32.mrb[1].mxu1 }
 0x132   :  { %621 = vpow2.f32 %v457_v23  ;;  %v194_v24 = vpop.f32.mrb[2].mxu0 }
 0x133   :  { %v458_v25 = vmul.f32 -1.442695, %v194_v24  ;;  %v196_v26 = vpop.f32.mrb[3].mxu0 }
 0x134   :  { %v459_v27 = vmul.f32 -1.442695, %v196_v26  ;;  %v271_v33 = vpop.f32.mrb[2].mxu1 }
 0x135   :  { %623 = vpow2.f32 %v458_v25  ;;  %v273_v35 = vpop.f32.mrb[3].mxu1 }
 0x136   :  { %625 = vpow2.f32 %v459_v27 }
 0x13b   :  { %v620_v30 = vpop.eup %619 }
 0x13c   :  { %v622_v31 = vpop.eup %621  ;;  %v288_v32 = vadd.f32 1.0, %v620_v30 }
 0x13d   :  { %v289_v34 = vadd.f32 1.0, %v622_v31 }
 0x13e   :  { %627 = vrcp.f32 %v288_v32 }
 0x13f   :  { %v624_v36 = vpop.eup %623  ;;  %629 = vrcp.f32 %v289_v34 }
 0x140   :  { %v626_v37 = vpop.eup %625  ;;  %v290_v38 = vadd.f32 1.0, %v624_v36 }
 0x141   :  { %v291_v39 = vadd.f32 1.0, %v626_v37 }
 0x142   :  { %631 = vrcp.f32 %v290_v38 }
 0x143   :  { %633 = vrcp.f32 %v291_v39 }
 0x148   :  { %v628_v40 = vpop.eup %627 }
 0x149   :  { %v630_v41 = vpop.eup %629  ;;  %v300_v42 = vmul.f32 %v628_v40, %v188_v20 }
 0x14a   :  { %v301_v43 = vmul.f32 %v630_v41, %v190_v22 }
 0x14b   :  { %v304_v44 = vmul.f32 %v300_v42, %v265_v28 }
 0x14c   :  { %v632_v45 = vpop.eup %631  ;;  %v305_v46 = vmul.f32 %v301_v43, %v267_v29 }
 0x14d   :  { %v634_v47 = vpop.eup %633  ;;  %v302_v0 = vmul.f32 %v632_v45, %v194_v24 }
 0x14e   :  { %v303_v48 = vmul.f32 %v634_v47, %v196_v26  ;;  %404 = vmatprep.mubr.f32.mxu0 %v305_v46 }
 0x14f   :  { %v306_v49 = vmul.f32 %v302_v0, %v271_v33  ;;  %405 = vmatmul.mubr.f32.vlgmr.msra.gmra.mrb[4].mxu0 %v304_v44 }
 0x150   :  { %v307_v50 = vmul.f32 %v303_v48, %v273_v35 }
 0x152   :  { %409 = vmatprep.mubr.f32.mxu1 %v307_v50 }
 0x153   :  { %410 = vmatmul.mubr.f32.vlgmr.msra.gmra.mrb[4].mxu1 %v306_v49 }
 0x222   :  { %v492_v51 = vpop.f32.mrb[4].mxu0 }
 0x223   :  { %v493_v52 = vpop.f32.mrb[5].mxu0 }
 0x224   :  { %v494_v53 = vadd.f32 %v493_v52, %v492_v51 }
 0x226   :  { %436 = vst [vmem:[#allocation9] sm:$0xff] %v494_v53  ;;  %v495_v54 = vpop.f32.mrb[4].mxu1 }
 0x227   :  { %v496_v55 = vpop.f32.mrb[5].mxu1 }
 0x228   :  { %v497_v56 = vadd.f32 %v496_v55, %v495_v54 }
 0x22a   :  { %437 = vst [vmem:[#allocation9 + $0x8] sm:$0xff] %v497_v56 }
 0x22b   :  { %712 = shalt.err (!%p709_p0)
}
 0x22c   :  { %s713_s27 = scalar_lea.hbm %s822_s3, 256 }
 0x22d   :  { %p714_p1 = scmp.ne.s32.totalorder %s822_s3, %s713_s27  ;;  %p717_p2 = scmp.lt.u32.totalorder %s713_s27, %s822_s3 }
 0x22f   :  { %p719_p3 = pnand %p717_p2, %p714_p1 }
 0x231   :  { %722 = shalt.err (!%p719_p3)
}
 0x232   :  { %449 = dma.vmem_to_hbm [thread:$0]  %s444_s23, 256, %s822_s3, [#allocation5], %s733_s1, %s733_s1, %s734_s9  }
 0x233   :  { %727 = dma.done.wait [#allocation5], 256  }
 0x234   :  { %728 = vsyncadd [#allocation5], 4294967040 }
 0x235   :  { %453 = vsyncpa [#allocation4], 1 }
 0x236   :  { %454 = vsyncpa [#allocation7], 1 }
 0x237   :  { %455 = vsyncpa [#allocation5], 1 }

</bundles_post_ra>
